<compile_context>
chip_gen: v7x
topology: tpu7x:2x2x1
jax: 0.10.0
libtpu: 0.0.40
codegen_flags: <defaults>
</compile_context>

<pallas_src>
import jax
import jax.numpy as jnp
from jax.experimental import pallas as pl
from jax.experimental.pallas import tpu as pltpu


def _multi_attention_kernel(len_ref, seq_ref, w1_ref, w2_ref, avg_ref, attn_ref):
    b = pl.program_id(0)

    seq = seq_ref[0]                                   # (L, D) f32
    # linear_first (no bias) + tanh  -> (L, A)
    h = jnp.tanh(
        jnp.dot(seq, w1_ref[...], preferred_element_type=jnp.float32))
    # linear_second (no bias)        -> (L, H)
    scores = jnp.dot(h, w2_ref[...], preferred_element_type=jnp.float32)

    logits = scores.T                                  # (H, L): seq len on lanes
    length = len_ref[b]                                # scalar from SMEM
    pos = jax.lax.broadcasted_iota(jnp.int32, logits.shape, 1)
    logits = jnp.where(pos < length, logits, -jnp.inf)

    # masked softmax over the sequence axis (lanes)
    m = jnp.max(logits, axis=-1, keepdims=True)
    e = jnp.exp(logits - m)
    denom = jnp.sum(e, axis=-1, keepdims=True)
    attn = e / denom                                   # (H, L)
    attn_ref[...] = attn[None].astype(attn_ref.dtype)

    # attention @ seq_input -> (H, D), then mean over hops -> (1, D)
    ctx = jnp.dot(attn, seq, preferred_element_type=jnp.float32)
    avg = jnp.mean(ctx, axis=0, keepdims=True)
    avg_ref[...] = avg[None].astype(avg_ref.dtype)


def multi_attention_layer(seq_input, lengths, w1, w2):
    """Pallas equivalent of MultiAttentionLayer.forward.

    seq_input: (B, L, D) float32
    lengths:   (B,)      int
    w1:        (A, D)    linear_first.weight (torch layout)
    w2:        (H, A)    linear_second.weight (torch layout)
    returns (avg_seq_embedding (B, D), attention (B, H, L))
    """
    B, L, D = seq_input.shape
    A = w1.shape[0]
    H = w2.shape[0]

    w1_t = w1.T                                        # (D, A)
    w2_t = w2.T                                        # (A, H)
    lengths = lengths.astype(jnp.int32)

    avg3, attn = pl.pallas_call(
        _multi_attention_kernel,
        out_shape=(
            jax.ShapeDtypeStruct((B, 1, D), seq_input.dtype),
            jax.ShapeDtypeStruct((B, H, L), seq_input.dtype),
        ),
        grid_spec=pltpu.PrefetchScalarGridSpec(
            num_scalar_prefetch=1,
            grid=(B,),
            in_specs=[
                pl.BlockSpec((1, L, D), lambda b, lens: (b, 0, 0)),
                pl.BlockSpec((D, A), lambda b, lens: (0, 0)),
                pl.BlockSpec((A, H), lambda b, lens: (0, 0)),
            ],
            out_specs=[
                pl.BlockSpec((1, 1, D), lambda b, lens: (b, 0, 0)),
                pl.BlockSpec((1, H, L), lambda b, lens: (b, 0, 0)),
            ],
        ),
        compiler_params=pltpu.CompilerParams(
            dimension_semantics=("parallel",)),
    )(lengths, seq_input, w1_t, w2_t)

    return avg3.reshape(B, D), attn


def _reference(seq_input, lengths, w1, w2):
    """Pure-JAX reference matching the PyTorch forward."""
    B, L, _ = seq_input.shape
    H = w2.shape[0]
    x = jnp.tanh(seq_input @ w1.T)                     # (B, L, A)
    x = x @ w2.T                                       # (B, L, H)
    attn = jnp.swapaxes(x, 1, 2)                       # (B, H, L)
    mask = jnp.arange(L)[None, :] < lengths[:, None]   # (B, L)
    mask = jnp.broadcast_to(mask[:, None, :], (B, H, L))
    attn = jnp.where(mask, attn, -jnp.inf)
    attn = jax.nn.softmax(attn, axis=-1)
    seq_emb = attn @ seq_input                         # (B, H, D)
    return seq_emb.mean(axis=1), attn


if __name__ == "__main__":
    key = jax.random.PRNGKey(0)
    k_seq, k_w1, k_w2 = jax.random.split(key, 3)

    # small shapes consistent with the module
    B, L, D = 2, 8, 32          # batch, max_len, input_size
    A, H = 16, 4                # attention_size, attention_hops

    seq_input = jax.random.normal(k_seq, (B, L, D), dtype=jnp.float32)
    w1 = jax.random.normal(k_w1, (A, D), dtype=jnp.float32) / jnp.sqrt(D)
    w2 = jax.random.normal(k_w2, (H, A), dtype=jnp.float32) / jnp.sqrt(A)
    lengths = jnp.array([5, 8], dtype=jnp.int32)

    avg, attn = multi_attention_layer(seq_input, lengths, w1, w2)
    avg, attn = jax.block_until_ready((avg, attn))

    ref_avg, ref_attn = _reference(seq_input, lengths, w1, w2)

    assert avg.shape == (B, D), avg.shape
    assert attn.shape == (B, H, L), attn.shape
    assert jnp.allclose(attn, ref_attn, atol=1e-4, rtol=1e-4), "attention mismatch"
    assert jnp.allclose(avg, ref_avg, atol=1e-4, rtol=1e-4), "avg embedding mismatch"

    print("KERNEL_OK")
</pallas_src>

<mosaic_0001>
module attributes {stable_mosaic.version = 11 : i64} {
  func.func @_multi_attention_kernel(%arg0: i32, %arg1: memref<2xi32, #tpu.memory_space<smem>>, %arg2: memref<1x8x32xf32, #tpu.memory_space<vmem>>, %arg3: memref<32x16xf32, #tpu.memory_space<vmem>>, %arg4: memref<16x4xf32, #tpu.memory_space<vmem>>, %arg5: memref<1x1x32xf32, #tpu.memory_space<vmem>>, %arg6: memref<1x4x8xf32, #tpu.memory_space<vmem>>) attributes {dimension_semantics = [#tpu.dimension_semantics<parallel>], iteration_bounds = array<i64: 2>, scalar_prefetch = 1 : i64, scratch_operands = 0 : i64, tpu.core_type = #tpu.core_type<tc>, window_params = [{transform_indices = @transform_0, window_bounds = array<i64: 1, 8, 32>}, {pipeline_mode = #tpu.pipeline_mode<synchronous>, transform_indices = @transform_1, window_bounds = array<i64: 32, 16>}, {pipeline_mode = #tpu.pipeline_mode<synchronous>, transform_indices = @transform_2, window_bounds = array<i64: 16, 4>}, {transform_indices = @transform_3, window_bounds = array<i64: 1, 1, 32>}, {transform_indices = @transform_4, window_bounds = array<i64: 1, 4, 8>}]} {
    %c0 = arith.constant 0 : index
    %c0_0 = arith.constant 0 : index
    %c0_1 = arith.constant 0 : index
    %0 = vector.load %arg2[%c0, %c0_0, %c0_1] : memref<1x8x32xf32, #tpu.memory_space<vmem>>, vector<1x8x32xf32>
    %1 = vector.shape_cast %0 : vector<1x8x32xf32> to vector<8x32xf32>
    %c0_2 = arith.constant 0 : index
    %c0_3 = arith.constant 0 : index
    %2 = vector.load %arg3[%c0_2, %c0_3] : memref<32x16xf32, #tpu.memory_space<vmem>>, vector<32x16xf32>
    %cst = arith.constant dense<0.000000e+00> : vector<8x16xf32>
    %3 = tpu.matmul %1, %2, %cst {dimension_numbers = #tpu.dot_dimension_numbers<[1], [0], [0], [1], [0, 0, 1, 1], [], []>} : vector<8x32xf32>, vector<32x16xf32>, vector<8x16xf32> -> vector<8x16xf32>
    %4 = math.tanh %3 : vector<8x16xf32>
    %c0_4 = arith.constant 0 : index
    %c0_5 = arith.constant 0 : index
    %5 = vector.load %arg4[%c0_4, %c0_5] : memref<16x4xf32, #tpu.memory_space<vmem>>, vector<16x4xf32>
    %cst_6 = arith.constant dense<0.000000e+00> : vector<8x4xf32>
    %6 = tpu.matmul %4, %5, %cst_6 {dimension_numbers = #tpu.dot_dimension_numbers<[1], [0], [0], [1], [0, 0, 1, 1], [], []>} : vector<8x16xf32>, vector<16x4xf32>, vector<8x4xf32> -> vector<8x4xf32>
    %7 = tpu.transpose %6, [1, 0] : vector<8x4xf32> -> vector<4x8xf32>
    %8 = arith.index_cast %arg0 : i32 to index
    %9 = memref.load %arg1[%8] : memref<2xi32, #tpu.memory_space<smem>>
    %10 = tpu.iota {dimensions = array<i32: 1>} : vector<4x8xi32>
    %11 = vector.broadcast %9 : i32 to vector<4x8xi32>
    %12 = arith.cmpi slt, %10, %11 : vector<4x8xi32>
    %cst_7 = arith.constant 0xFF800000 : f32
    %13 = vector.broadcast %cst_7 : f32 to vector<4x8xf32>
    %14 = arith.select %12, %7, %13 : vector<4x8xi1>, vector<4x8xf32>
    %cst_8 = arith.constant dense<0xFF800000> : vector<4xf32>
    %15 = vector.multi_reduction <maximumf>, %14, %cst_8 [1] : vector<4x8xf32> to vector<4xf32>
    %16 = vector.shape_cast %15 : vector<4xf32> to vector<4x1xf32>
    %17 = vector.broadcast %16 : vector<4x1xf32> to vector<4x8xf32>
    %18 = arith.subf %14, %17 : vector<4x8xf32>
    %19 = math.exp %18 : vector<4x8xf32>
    %cst_9 = arith.constant dense<0.000000e+00> : vector<4xf32>
    %20 = vector.multi_reduction <add>, %19, %cst_9 [1] : vector<4x8xf32> to vector<4xf32>
    %21 = vector.shape_cast %20 : vector<4xf32> to vector<4x1xf32>
    %22 = vector.broadcast %21 : vector<4x1xf32> to vector<4x8xf32>
    %23 = arith.divf %19, %22 : vector<4x8xf32>
    %24 = vector.shape_cast %23 : vector<4x8xf32> to vector<1x4x8xf32>
    %c0_10 = arith.constant 0 : index
    %c0_11 = arith.constant 0 : index
    %c0_12 = arith.constant 0 : index
    %25 = vector.load %arg6[%c0_10, %c0_11, %c0_12] : memref<1x4x8xf32, #tpu.memory_space<vmem>>, vector<1x4x8xf32>
    tpu.vector_store %arg6[%c0_10, %c0_11, %c0_12], %24 {strides = array<i32>} : memref<1x4x8xf32, #tpu.memory_space<vmem>>, vector<1x4x8xf32>,
    %cst_13 = arith.constant dense<0.000000e+00> : vector<4x32xf32>
    %26 = tpu.matmul %23, %1, %cst_13 {dimension_numbers = #tpu.dot_dimension_numbers<[1], [0], [0], [1], [0, 0, 1, 1], [], []>} : vector<4x8xf32>, vector<8x32xf32>, vector<4x32xf32> -> vector<4x32xf32>
    %cst_14 = arith.constant dense<0.000000e+00> : vector<32xf32>
    %27 = vector.multi_reduction <add>, %26, %cst_14 [0] : vector<4x32xf32> to vector<32xf32>
    %28 = vector.shape_cast %27 : vector<32xf32> to vector<1x32xf32>
    %cst_15 = arith.constant 4.000000e+00 : f32
    %29 = vector.broadcast %cst_15 : f32 to vector<1x32xf32>
    %30 = arith.divf %28, %29 : vector<1x32xf32>
    %31 = vector.shape_cast %30 : vector<1x32xf32> to vector<1x1x32xf32>
    %c0_16 = arith.constant 0 : index
    %c0_17 = arith.constant 0 : index
    %c0_18 = arith.constant 0 : index
    %32 = vector.load %arg5[%c0_16, %c0_17, %c0_18] : memref<1x1x32xf32, #tpu.memory_space<vmem>>, vector<1x1x32xf32>
    tpu.vector_store %arg5[%c0_16, %c0_17, %c0_18], %31 {strides = array<i32>} : memref<1x1x32xf32, #tpu.memory_space<vmem>>, vector<1x1x32xf32>,
    return
  }
  func.func @transform_0(%arg0: i32, %arg1: memref<2xi32, #tpu.memory_space<smem>>) -> (i32, i32, i32) {
    %c0_i32 = arith.constant 0 : i32
    %c0_i32_0 = arith.constant 0 : i32
    %c0_i32_1 = arith.constant 0 : i32
    return %arg0, %c0_i32, %c0_i32_0 : i32, i32, i32
  }
  func.func @transform_1(%arg0: i32, %arg1: memref<2xi32, #tpu.memory_space<smem>>) -> (i32, i32) {
    %c0_i32 = arith.constant 0 : i32
    %c0_i32_0 = arith.constant 0 : i32
    %c0_i32_1 = arith.constant 0 : i32
    return %c0_i32, %c0_i32_0 : i32, i32
  }
  func.func @transform_2(%arg0: i32, %arg1: memref<2xi32, #tpu.memory_space<smem>>) -> (i32, i32) {
    %c0_i32 = arith.constant 0 : i32
    %c0_i32_0 = arith.constant 0 : i32
    %c0_i32_1 = arith.constant 0 : i32
    return %c0_i32, %c0_i32_0 : i32, i32
  }
  func.func @transform_3(%arg0: i32, %arg1: memref<2xi32, #tpu.memory_space<smem>>) -> (i32, i32, i32) {
    %c0_i32 = arith.constant 0 : i32
    %c0_i32_0 = arith.constant 0 : i32
    %c0_i32_1 = arith.constant 0 : i32
    return %arg0, %c0_i32, %c0_i32_0 : i32, i32, i32
  }
  func.func @transform_4(%arg0: i32, %arg1: memref<2xi32, #tpu.memory_space<smem>>) -> (i32, i32, i32) {
    %c0_i32 = arith.constant 0 : i32
    %c0_i32_0 = arith.constant 0 : i32
    %c0_i32_1 = arith.constant 0 : i32
    return %arg0, %c0_i32, %c0_i32_0 : i32, i32, i32
  }
}

</mosaic_0001>

<bundles_post_ra>
// kernel: tpu_custom_call.1
= control target key start
LH: loop header
LB: loop body
LE: loop exit
PB: predicated region body
PF: predicated region fallthrough
CT: control target
= control target key end

     0   :  { %s1034_s0 = inlined_call_operand.vmem [shape: s32[2], index: 0, kind: input, shape index: {}]   ;;  %s1035_s1 = inlined_call_operand.vmem [shape: f32[2,8,32], index: 1, kind: input, shape index: {}]   ;;  %s1036_s2 = inlined_call_operand.vmem [shape: f32[32,16], index: 2, kind: input, shape index: {}]   ;;  %s1037_s3 = inlined_call_operand.vmem [shape: f32[16,4], index: 3, kind: input, shape index: {}]   ;;  %s1038_s4 = inlined_call_operand.hbm [shape: f32[2,1,32], index: 4, kind: output, shape index: {0}]   ;;  %s1039_s5 = inlined_call_operand.hbm [shape: f32[2,4,8], index: 5, kind: output, shape index: {1}]  }
   0x1   :  { %s11_s20 = sshll.u32 %s1034_s0, 4  ;;  %s12_s20 = int_to_ptr.vmem [resolvable:$true] %s11_s20 }
   0x2   :  { %s731_s21 = scalar_lea.vmem %s12_s20, 16  ;;  %p736_p1 = scmp.lt.s32.totalorder %s12_s20, %s12_s20 }
   0x3   :  { %p732_p0 = scmp.ne.s32.totalorder %s12_s20, %s731_s21  ;;  %p737_p2 = scmp.lt.s32.totalorder %s731_s21, %s731_s21 }
   0x5   :  { %p738_p3 = por %p737_p2, %p736_p1 }
   0x7   :  { %p739_p4 = pnand %p738_p3, %p732_p0 }
   0x9   :  { %742 = shalt.err (!%p739_p4)  }
   0xa   :  { %s841_s22 = smov [#allocation3]  }
   0xb   :  { %14 = dma.vmem_to_smem %s12_s20, 16, %s841_s22, [#allocation2] }
   0xc   :  { %815 = dma.done.wait [#allocation2], 16 }
   0xd   :  { %816 = vsyncadd [#allocation2], 4294967280 }
   0xe   :  { %16 = sfence }
   0xf   :  { %17 = vsyncpa [#allocation5], 0 }
  0x10   :  { %19 = vsyncpa [#allocation5 + $0x1], 0 }
  0x11   :  { %20 = vsyncpa [#allocation7], 0 }
  0x12   :  { %22 = vsyncpa [#allocation7 + $0x1], 0  ;;  %s880_s23 = smov 0   ;;  %s882_s0 = smov 0  }
  0x13   :  { %s884_s24 = smov 0   ;;  %s886_s25 = smov 0  }
  0x14 LB: > { %s901_s26 = sadd.s32 4294967295, %s839_s25   ;;  %s621_s27 = sadd.s32 4294967294, %s839_s25   ;;  %s839_s25 = sphi %s886_s25, %s1045_s25   ;;  %s835_s24 = sphi %s884_s24, %s1044_s24   ;;  %s831_s0 = sphi %s882_s0, %s1043_s0   ;;  %s827_s23 = sphi %s880_s23, %s1042_s23  }
  0x15   : > { %s905_s28 = sadd.s32 1, %s839_s25   ;;  %s103_s29 = sadd.s32 1, %s835_s24 }
  0x16   : > { %s100_s30 = ssub.s32 %s839_s25, %s905_s28  ;;  %p113_p5 = scmp.ne.s32.totalorder %s835_s24, %s831_s0 }
  0x17   : > { %p101_p6 = scmp.eq.s32.totalorder %s100_s30, 0  ;;  %p114_p7 = scmp.eq.s32.totalorder %s901_s26, 1 }
  0x18   : > { %p119_p8 = scmp.ne.s32.totalorder %s831_s0, %s827_s23  ;;  %p120_p9 = scmp.eq.s32.totalorder %s621_s27, 1 }
  0x19   : > { %s916_s6 = scalar_select %p101_p6, %s835_s24, %s103_s29  }
  0x1a   : > { %p918_p10 = por %p114_p7, %p113_p5  ;;  %p922_p11 = por %p120_p9, %p119_p8 }
  0x1b   : > { %p624_p12 = scmp.ge.s32.totalorder %s839_s25, 1  ;;  %p177_p13 = scmp.lt.s32.totalorder %s839_s25, 3 }
  0x1d   : > { %p178_p0 = pnand %p624_p12, %p177_p13 }
  0x1e   : > { %v211_v0 = vld [vmem:[%s1036_s2] sm:$0xff] (!%p178_p0)  ;;  %v212_v1 = vld [vmem:[%s1036_s2 + $0x8] sm:$0xff] (!%p178_p0)  ;;  %v213_v2 = vld [vmem:[%s1036_s2 + $0x10] sm:$0xff] (!%p178_p0)  ;;  %v842_v3 = vmov (!%p178_p0), 0.0|0.0   ;;  %vm843_vm0 = vmmov (!%p178_p0), 0   ;;  %v844_v6 = vmov (!%p178_p0), 0.0   ;;  %v399_v17 = vlaneseq (!%p178_p0) }
  0x1f   : > { %181 = sbr.rel (%p178_p0) target bundleno = 1163 (0x48b), region = 32  ;;  %668 = vmatprep.subr.bf16.mxu0 (!%p178_p0), %v842_v3  ;;  %v669_v4 = vpack.c.bf16 (!%p178_p0), %v212_v1, %v211_v0  ;;  %v214_v5 = vld [vmem:[%s1036_s2 + $0x18] sm:$0xff] (!%p178_p0)  ;;  %653 = vmatprep.mubr.msk.f32.mxu0 (!%p178_p0), %vm843_vm0, %v844_v6  ;;  %p206_p1 = scmp.lt.s32.totalorder (!%p178_p0), %s901_s26, 1  ;;  %vm215_vm1 = vcmask (!%p178_p0), 261120   ;;  %v290_v9 = vld [vmem:[%s1037_s3] sm:$0xff] (!%p178_p0)  ;;  %v291_v10 = vld [vmem:[%s1037_s3 + $0x8] sm:$0xff] (!%p178_p0) }
  0x20   : > { %674 = vmatprep.subr.bf16.mxu1 (!%p178_p0), %v842_v3  ;;  %660 = vmatprep.mubr.msk.f32.mxu1 (!%p178_p0), %vm843_vm0, %v844_v6  ;;  %v672_v7 = vpack.c.bf16 (!%p178_p0), %v214_v5, %v213_v2  ;;  %v675_v11 = vpack.c.bf16 (!%p178_p0), %v291_v10, %v290_v9  ;;  %vm292_vm2 = vcmask (!%p178_p0), 130048   ;;  %s398_s9 = sld [smem:[#allocation3 + %s901_s26]] (!%p178_p0)  ;;  %v400_v18 = vand.u32 (!%p178_p0), 127, %v399_v17  ;;  %s958_s10 = sand.u32 (!%p178_p0), 1, %s831_s0  }
  0x21   : > { %670 = vmatpush3.bf16.msra.mxu0 (!%p178_p0), %v669_v4  ;;  %vm404_vm4 = vcmask (!%p178_p0), 60416   ;;  %s625_s11 = sshll.u32 (!%p178_p0), %s958_s10, 2  ;;  %vm417_vm5 = vcmask (!%p178_p0), 64512   ;;  %s632_s13 = sshll.u32 (!%p178_p0), %s901_s26, 6 }
  0x22   : > { %671 = vmatprep.subr.bf16.mxu0 (!%p178_p0), %v842_v3  ;;  %676 = vmatpush3.bf16.msra.mxu1 (!%p178_p0), %v675_v11  ;;  %s205_s12 = scalar_lea.vmem (!%p178_p0), [#allocation6], %s625_s11  ;;  %s845_s20 = smov (!%p178_p0), [#allocation6]  }
  0x23   : > { %663 = vmatprep.subr.mxu1 (!%p178_p0), %v844_v6  ;;  %s534_s14 = sshll.u32 (!%p178_p0), %s205_s12, 4  ;;  %s535_s14 = int_to_ptr.vmem [resolvable:$true] %s534_s14 }
  0x24   : > { %s743_s19 = scalar_lea.vmem (!%p178_p0), %s535_s14, 64 }
  0x25   : > { %673 = vmatpush3.bf16.msra.mxu0 (!%p178_p0), %v672_v7  ;;  %p744_p2 = scmp.ne.s32.totalorder (!%p178_p0), %s535_s14, %s743_s19 }
  0x26   : > { %s207_s17 = scalar_select %p206_p1, %s901_s26, 1  ;;  %v401_v19 = vstv %s398_s9 }
  0x27   : > { %vm402_vm3 = vcmp.lt.s32.totalorder %v400_v18, %v401_v19  ;;  %p745_p3 = pnand %p744_p2, %p918_p10 }
  0x28   : > { %s626_s18 = sshll.u32 %s207_s17, 3  ;;  %s966_s17 = scalar_lea.hbm %s1039_s5, %s632_s13 }
  0x29   : > { %s209_s21 = scalar_lea.vmem %s1035_s1, %s626_s18  ;;  %s508_s18 = scalar_lea.sflag [#allocation7], %s958_s10 }
  0x2a   : > { %v210_v8 = vld [vmem:[%s209_s21] sm:$0xff]  ;;  %p746_p4 = pneg %p745_p3  ;;  %s747_s21 = sshll.u32 %s845_s20, 4  ;;  %s748_s21 = int_to_ptr.vmem [resolvable:$false] %s747_s21 }
  0x2b   : > { %654 = vmatmul.mubr.msk.f32.vlgmr.msra.gmra.mrb[0].mxu0 %vm215_vm1, %v210_v8  ;;  %s749_s22 = scalar_lea.vmem %s748_s21, 128  ;;  %p750_p5 = scmp.lt.s32.totalorder %s535_s14, %s748_s21 }
  0x2c   : > { %p751_p6 = scmp.lt.s32.totalorder %s749_s22, %s743_s19 }
  0x2e   : > { %p752_p7 = por %p751_p6, %p750_p5 }
  0x30   : > { %p753_p8 = pnand %p752_p7, %p746_p4 }
  0xfe   : > { %v285_v12 = vpop.f32.mrb[0].mxu0 }
  0xff   : > { %725 = vtanh.f32 %v285_v12  ;;  %v655_v13 = vpop.f32.mrb[1].mxu0 }
 0x109   : > { %v726_v14 = vpop.eup %725 }
 0x10a   : > { %661 = vmatmul.mubr.msk.f32.vlgmr.msra.gmra.mrb[0].mxu1 %vm292_vm2, %v726_v14 }
 0x10b   : > { %664 = vmatpush3.msra.mxu1 %v210_v8  ;;  %665 = vmatprep.mubr.msk.f32.mxu1 %vm843_vm0, %v844_v6 }
 0x1dd   : > { %v362_v15 = vpop.f32.mrb[0].mxu1 }
 0x1de   : > { %366 = vxpose.xlu0.b32.start.end [1/1] (short) (narrow) %v362_v15, 8  ;;  %v662_v16 = vpop.f32.mrb[1].mxu1 }
 0x25e   : > { %v382_v20 = vpop.trf.xlu0 }
 0x25f   : > { %v403_v21 = vsel %vm402_vm3, %v382_v20, -inf }
 0x260   : > { %v405_v22 = vsel %vm404_vm4, %v403_v21, -inf }
 0x261   : > { %406 = vmax.xlane.f32.xlu0 %v405_v22 }
 0x2ee   : > { %v407_v23 = vpop.xlane.xlu0 %406 }
 0x2ef   : > { %v408_v24 = vsub.f32 %v403_v21, %v407_v23 }
 0x2f1   : > { %v409_v25 = vmul.f32 1.442695, %v408_v24 }
 0x2f3   : > { %727 = vpow2.f32 %v409_v25 }
 0x2fd   : > { %v728_v26 = vpop.eup %727 }
 0x2fe   : > { %v411_v27 = vsel %vm404_vm4, %v728_v26, 0.0 }
 0x2ff   : > { %412 = vadd.xlane.f32.xlu1 %v411_v27 }
 0x38c   : > { %v413_v28 = vpop.xlane.xlu1 %412 }
 0x38d   : > { %729 = vrcp.f32 %v413_v28 }
 0x397   : > { %v730_v29 = vpop.eup %729 }
 0x398   : > { %v415_v30 = vmul.f32 %v730_v29, %v728_v26 }
 0x39a   : > { %666 = vmatmul.mubr.msk.f32.vlgmr.msra.gmra.mrb[2].mxu1 %vm417_vm5, %v415_v30  ;;  %416 = vst.msk [vmem:[%s205_s12] sm:$0xf] %vm404_vm4, %v415_v30 }
 0x39b   : > { %756 = shalt.err (!%p753_p8)
}
 0x39c   : > { %s757_s27 = scalar_lea.hbm %s966_s17, 64  ;;  %s761_s9 = scalar_lea.hbm %s1039_s5, 128 }
 0x39d   : > { %p758_p9 = scmp.ne.s32.totalorder %s966_s17, %s757_s27  ;;  %p762_p0 = scmp.lt.u32.totalorder %s966_s17, %s1039_s5 }
 0x39e   : > { %p763_p1 = scmp.lt.u32.totalorder %s761_s9, %s757_s27  ;;  %p765_p3 = scmp.lt.u32.totalorder %s757_s27, %s966_s17 }
 0x39f   : > { %p759_p12 = pnand %p758_p9, %p918_p10 }
 0x3a0   : > { %p764_p2 = por %p763_p1, %p762_p0 }
 0x3a1   : > { %p760_p13 = pneg %p759_p12 }
 0x3a2   : > { %p766_p4 = por %p765_p3, %p764_p2 }
 0x3a4   : > { %p767_p5 = pnand %p766_p4, %p760_p13 }
 0x3a6   : > { %770 = shalt.err (!%p767_p5)
}
 0x3a7   : > { %678 = dma.vmem_to_hbm [thread:$0]  (%p918_p10), %s535_s14, 64, %s966_s17, %s508_s18   ;;  %vm491_vm6 = vcmask 257024   ;;  %vm501_vm7 = vcmask 253952  }
 0x3a8   : > { %s631_s13 = sshll.u32 %s901_s26, 4  ;;  %s198_s15 = scalar_lea.vmem [#allocation4], %s958_s10 }
 0x3a9   : > { %s521_s16 = sshll.u32 %s198_s15, 4  ;;  %s991_s14 = scalar_lea.hbm %s1038_s4, %s631_s13  ;;  %s993_s16 = int_to_ptr.vmem [resolvable:$true] %s521_s16 }
 0x3aa   : > { %s504_s17 = scalar_lea.sflag [#allocation5], %s958_s10  ;;  %s771_s18 = scalar_lea.vmem %s993_s16, 16 }
 0x3ab   : > { %p772_p6 = scmp.ne.s32.totalorder %s993_s16, %s771_s18  ;;  %s846_s26 = smov [#allocation4]  }
 0x3ac   : > { %s775_s21 = sshll.u32 %s846_s26, 4  ;;  %s776_s21 = int_to_ptr.vmem [resolvable:$false] %s775_s21 }
 0x3ad   : > { %p773_p7 = pnand %p772_p6, %p918_p10  ;;  %s777_s22 = scalar_lea.vmem %s776_s21, 32 }
 0x3ae   : > { %p778_p9 = scmp.lt.s32.totalorder %s993_s16, %s776_s21  ;;  %p779_p12 = scmp.lt.s32.totalorder %s777_s22, %s771_s18 }
 0x3af   : > { %p774_p8 = pneg %p773_p7 }
 0x3b0   : > { %p780_p13 = por %p779_p12, %p778_p9 }
 0x3b2   : > { %p781_p0 = pnand %p780_p13, %p774_p8 }
 0x46d   : > { %v487_v31 = vpop.f32.mrb[2].mxu1 }
 0x46e   : > { %v492_v32 = vsel %vm491_vm6, %v487_v31, 0.0  ;;  %v667_v33 = vpop.f32.mrb[3].mxu1 }
 0x46f   : > { %v493_v34 = vrot.slane %v492_v32, 4 }
 0x471   : > { %v494_v35 = vadd.f32 %v493_v34, %v492_v32 }
 0x473   : > { %v495_v36 = vrot.slane %v494_v35, 2 }
 0x475   : > { %v496_v37 = vadd.f32 %v495_v36, %v494_v35 }
 0x477   : > { %v497_v38 = vrot.slane %v496_v37, 1 }
 0x479   : > { %v498_v39 = vadd.f32 %v497_v38, %v496_v37 }
 0x47b   : > { %v500_v40 = vmul.f32 0.25, %v498_v39 }
 0x47d   : > { %502 = vst.msk [vmem:[%s198_s15] sm:$0x1] %vm501_vm7, %v500_v40 }
 0x47e   : > { %784 = shalt.err (!%p781_p0)
}
 0x47f   : > { %s785_s10 = scalar_lea.hbm %s991_s14, 16  ;;  %s789_s30 = scalar_lea.hbm %s1038_s4, 32 }
 0x480   : > { %p786_p1 = scmp.ne.s32.totalorder %s991_s14, %s785_s10  ;;  %p790_p4 = scmp.lt.u32.totalorder %s991_s14, %s1038_s4 }
 0x481   : > { %p791_p5 = scmp.lt.u32.totalorder %s789_s30, %s785_s10  ;;  %p793_p7 = scmp.lt.u32.totalorder %s785_s10, %s991_s14 }
 0x482   : > { %p787_p2 = pnand %p786_p1, %p918_p10 }
 0x483   : > { %p792_p6 = por %p791_p5, %p790_p4 }
 0x484   : > { %p788_p3 = pneg %p787_p2 }
 0x485   : > { %p794_p8 = por %p793_p7, %p792_p6 }
 0x487   : > { %p795_p9 = pnand %p794_p8, %p788_p3 }
 0x489   : > { %798 = shalt.err (!%p795_p9)
}
 0x48a   : > { %677 = dma.vmem_to_hbm [thread:$0]  (%p918_p10), %s993_s16, 16, %s991_s14, %s504_s17  }
 0x48b PF: > { %p688_p12 = scmp.ge.s32.totalorder %s839_s25, 2  ;;  %s546_s12 = sand.u32 1, %s827_s23  }
 0x48c   : > { %s547_s13 = scalar_lea.sflag [#allocation5], %s546_s12 }
 0x48d   : > { %p682_p13 = pnand %p688_p12, %p922_p11 }
 0x48f   : > { %818 = dma.done.wait (!%p682_p13), %s547_s13, 16  }
 0x490   : > { %820 = vsyncadd (!%p682_p13), %s547_s13, 4294967280  ;;  %s555_s15 = scalar_lea.sflag [#allocation7], %s546_s12 }
 0x491   : > { %822 = dma.done.wait (!%p682_p13), %s555_s15, 64  }
 0x492   : > { %824 = vsyncadd (!%p682_p13), %s555_s15, 4294967232  ;;  %p25_p10 = scmp.ge.s32.totalorder %s905_s28, 4   ;;  %s1042_s23 = smov %s831_s0 }
 0x493   : > { %s1043_s0 = smov %s835_s24  ;;  %s1044_s24 = smov %s916_s6 }
 0x494   : > { %s1045_s25 = smov %s905_s28  ;;  %27 = sbr.rel (!%p25_p10) target bundleno = 20 (0x14), region = 84 }
 0x49b   :  { %560 = vsyncpa [#allocation5], 1 }
 0x49c   :  { %562 = vsyncpa [#allocation5 + $0x1], 1 }
 0x49d   :  { %563 = vsyncpa [#allocation7], 1 }
 0x49e   :  { %565 = vsyncpa [#allocation7 + $0x1], 1 }

</bundles_post_ra>
